<compile_context>
chip_gen: v5e
topology: v5e:2x2
jax: 0.10.0
libtpu: 0.0.40
codegen_flags: <defaults>
</compile_context>

<pallas_src>
import jax
import jax.numpy as jnp
from jax.experimental import pallas as pl
from jax.experimental.pallas import tpu as pltpu


def _round_up(n, m):
    return (n + m - 1) // m * m


def prepare_ensemble_params(weights, biases):
    """One-time (init-time) prep — keep this OUT of the per-call hot path.

    weights: (M, H, C) f32, biases: (M, 1, C) f32
    Returns:
      w_prep : (Kp, Cp) bf16 — members stacked along the contraction axis
               (row m*H + h = W[m, h, :]), zero-padded to MXU/lane multiples.
      b_mean : (1, Cp) f32   — mean over members of the biases, lane-padded.
    """
    M, H, C = weights.shape
    K = M * H
    Kp = _round_up(K, 128)
    Cp = _round_up(C, 128)

    w_stacked = weights.reshape(K, C).astype(jnp.bfloat16)
    w_prep = jnp.zeros((Kp, Cp), jnp.bfloat16).at[:K, :C].set(w_stacked)

    b_mean = jnp.zeros((1, Cp), jnp.float32).at[0, :C].set(
        jnp.mean(biases.reshape(M, C), axis=0).astype(jnp.float32)
    )
    return w_prep, b_mean


def ensemble_averaging(x, w_prep, b_mean, *, num_members, num_classes):
    """x: (B, H) f32; w_prep/b_mean from prepare_ensemble_params -> (B, C) f32."""
    B, H = x.shape
    M = num_members
    C = num_classes
    K = M * H
    Kp, Cp = w_prep.shape
    assert K <= Kp and C <= Cp
    inv_m = 1.0 / M

    # ---- Tile selection -----------------------------------------------------
    # Batch: sublane-aligned for small B; 128/256-aligned tiles for large B
    # (never "whole batch in one tile" for large non-aligned B).
    if B <= 128:
        TB = _round_up(B, 8)
        Bp = TB
    else:
        Bp = _round_up(B, 128)
        TB = 256 if Bp % 256 == 0 else 128
    # N (classes): 256-wide tiles when possible (v6e/v7x 256x256 MXU), else 128.
    TN = 256 if Cp % 256 == 0 else 128
    # K (stacked member*hidden): keep resident if modest, else tile it so the
    # weight block stays bounded (v7x has only 64 MiB VMEM).
    if Kp <= 1024:
        TK = Kp
    else:
        TK = max(c for c in (1024, 512, 256, 128) if Kp % c == 0)

    num_b_tiles = Bp // TB
    num_n_tiles = Cp // TN
    num_k_tiles = Kp // TK

    # ---- Per-call activation prep (cheap: only x) ---------------------------
    # LHS for the stacked-K matmul: x repeated M times along K, matching the
    # (m*H + h) row layout of w_prep. bf16 operands, f32 MXU accumulation.
    xb = x.astype(jnp.bfloat16)
    x_rep = jnp.zeros((Bp, Kp), jnp.bfloat16).at[:B, :K].set(jnp.tile(xb, (1, M)))

    # ---- Kernel --------------------------------------------------------------
    def kernel(x_ref, w_ref, b_ref, o_ref, acc_ref):
        # x_ref: (TB, TK) bf16; w_ref: (TK, TN) bf16; b_ref: (1, TN) f32
        # o_ref: (TB, TN) f32;  acc_ref: (TB, TN) f32 scratch
        k = pl.program_id(2)

        @pl.when(k == 0)
        def _():
            acc_ref[...] = jnp.zeros_like(acc_ref)

        acc_ref[...] += jnp.dot(
            x_ref[...], w_ref[...], preferred_element_type=jnp.float32
        )

        @pl.when(k == pl.num_programs(2) - 1)
        def _():
            # acc = sum_m x @ W_m  ->  mean = acc/M + mean_m(b_m)
            o_ref[...] = (acc_ref[...] * inv_m + b_ref[...]).astype(o_ref.dtype)

    # ---- BlockSpecs ----------------------------------------------------------
    # Weight / bias blocks are constant when the K/N grid collapses to 1:
    # single-buffer them (no point double-buffering a block that never changes).
    consts_single_buffered = (num_k_tiles == 1 and num_n_tiles == 1)
    if consts_single_buffered:
        w_spec = pl.BlockSpec((TK, TN), lambda i, j, k: (k, j),
                              pipeline_mode=pl.Buffered(1))
        b_spec = pl.BlockSpec((1, TN), lambda i, j, k: (0, j),
                              pipeline_mode=pl.Buffered(1))
        n_const_bufs = 1
    else:
        w_spec = pl.BlockSpec((TK, TN), lambda i, j, k: (k, j))
        b_spec = pl.BlockSpec((1, TN), lambda i, j, k: (0, j))
        n_const_bufs = 2
    x_spec = pl.BlockSpec((TB, TK), lambda i, j, k: (i, k))
    o_spec = pl.BlockSpec((TB, TN), lambda i, j, k: (i, j))

    # ---- Explicit VMEM budget ------------------------------------------------
    vmem_needed = (
        2 * TB * TK * 2                 # x tile, double-buffered, bf16
        + n_const_bufs * TK * TN * 2    # weight tile(s), bf16
        + n_const_bufs * 8 * TN * 4     # bias row (sublane-padded to 8), f32
        + 2 * TB * TN * 4               # output tile, double-buffered, f32
        + TB * TN * 4                   # accumulator scratch, f32
    )
    vmem_limit_bytes = min(max(2 * vmem_needed, 32 * 1024 * 1024),
                           100 * 1024 * 1024)

    out_padded = pl.pallas_call(
        kernel,
        out_shape=jax.ShapeDtypeStruct((Bp, Cp), jnp.float32),
        grid_spec=pltpu.PrefetchScalarGridSpec(
            num_scalar_prefetch=0,
            grid=(num_b_tiles, num_n_tiles, num_k_tiles),  # reduction axis last
            in_specs=[x_spec, w_spec, b_spec],
            out_specs=o_spec,
            scratch_shapes=[pltpu.VMEM((TB, TN), jnp.float32)],
        ),
        compiler_params=pltpu.CompilerParams(
            dimension_semantics=("parallel", "parallel", "arbitrary"),
            vmem_limit_bytes=vmem_limit_bytes,
        ),
    )(x_rep, w_prep, b_mean)

    return out_padded[:B, :C]


if __name__ == "__main__":
    # Small deterministic shapes: batch=8, hidden=32, classes=16, ensemble of 3.
    B, H, C, M = 8, 32, 16, 3

    key = jax.random.PRNGKey(0)
    kx, kw, kb = jax.random.split(key, 3)
    x = jax.random.normal(kx, (B, H), dtype=jnp.float32)
    weights = jax.random.normal(kw, (M, H, C), dtype=jnp.float32) * 0.1
    biases = jax.random.normal(kb, (M, 1, C), dtype=jnp.float32) * 0.01

    # One-time parameter prep (hoisted out of the per-call hot path).
    w_prep, b_mean = prepare_ensemble_params(weights, biases)
    (w_prep, b_mean) = jax.block_until_ready((w_prep, b_mean))

    out = ensemble_averaging(x, w_prep, b_mean, num_members=M, num_classes=C)
    jax.block_until_ready(out)

    # Pure-JAX reference: mean over ensemble members of (x @ W_m + b_m),
    # using the same bf16-quantized operands the kernel feeds the MXU.
    xq = x.astype(jnp.bfloat16).astype(jnp.float32)
    wq = weights.astype(jnp.bfloat16).astype(jnp.float32)
    ref = jnp.mean(jnp.einsum("bh,mhc->mbc", xq, wq) + biases, axis=0)

    assert out.shape == (B, C)
    assert jnp.allclose(out, ref, atol=1e-3, rtol=1e-3)

    print("KERNEL_OK")
</pallas_src>

<mosaic_0001>
module attributes {stable_mosaic.version = 11 : i64} {
  func.func @kernel(%arg0: i32, %arg1: i32, %arg2: i32, %arg3: memref<8x128xbf16, #tpu.memory_space<vmem>>, %arg4: memref<128x128xbf16, #tpu.memory_space<vmem>>, %arg5: memref<1x128xf32, #tpu.memory_space<vmem>>, %arg6: memref<8x128xf32, #tpu.memory_space<vmem>>, %arg7: memref<8x128xf32, #tpu.memory_space<vmem>>) attributes {dimension_semantics = [#tpu.dimension_semantics<parallel>, #tpu.dimension_semantics<parallel>, #tpu.dimension_semantics<arbitrary>], iteration_bounds = array<i64: 1, 1, 1>, scalar_prefetch = 0 : i64, scratch_operands = 1 : i64, tpu.core_type = #tpu.core_type<tc>, window_params = [{transform_indices = @transform_0, window_bounds = array<i64: 8, 128>}, {pipeline_mode = #tpu.pipeline_mode<synchronous>, transform_indices = @transform_1, window_bounds = array<i64: 128, 128>}, {pipeline_mode = #tpu.pipeline_mode<synchronous>, transform_indices = @transform_2, window_bounds = array<i64: 1, 128>}, {transform_indices = @transform_3, window_bounds = array<i64: 8, 128>}]} {
    %c0_i32 = arith.constant 0 : i32
    %0 = arith.cmpi eq, %arg2, %c0_i32 : i32
    %1 = arith.extui %0 : i1 to i32
    %c0_i32_0 = arith.constant 0 : i32
    %2 = arith.cmpi ne, %1, %c0_i32_0 : i32
    scf.if %2 {
      %cst_10 = arith.constant 0.000000e+00 : f32
      %12 = vector.broadcast %cst_10 : f32 to vector<8x128xf32>
      %c0_11 = arith.constant 0 : index
      %c0_12 = arith.constant 0 : index
      %13 = vector.load %arg7[%c0_11, %c0_12] : memref<8x128xf32, #tpu.memory_space<vmem>>, vector<8x128xf32>
      tpu.vector_store %arg7[%c0_11, %c0_12], %12 {strides = array<i32>} : memref<8x128xf32, #tpu.memory_space<vmem>>, vector<8x128xf32>,
    } else {
    }
    %c0 = arith.constant 0 : index
    %c0_1 = arith.constant 0 : index
    %3 = vector.load %arg7[%c0, %c0_1] : memref<8x128xf32, #tpu.memory_space<vmem>>, vector<8x128xf32>
    %c0_2 = arith.constant 0 : index
    %c0_3 = arith.constant 0 : index
    %4 = vector.load %arg3[%c0_2, %c0_3] : memref<8x128xbf16, #tpu.memory_space<vmem>>, vector<8x128xbf16>
    %c0_4 = arith.constant 0 : index
    %c0_5 = arith.constant 0 : index
    %5 = vector.load %arg4[%c0_4, %c0_5] : memref<128x128xbf16, #tpu.memory_space<vmem>>, vector<128x128xbf16>
    %cst = arith.constant dense<0.000000e+00> : vector<8x128xf32>
    %6 = tpu.matmul %4, %5, %cst {dimension_numbers = #tpu.dot_dimension_numbers<[1], [0], [0], [1], [0, 0, 1, 1], [], []>} : vector<8x128xbf16>, vector<128x128xbf16>, vector<8x128xf32> -> vector<8x128xf32>
    %7 = arith.addf %3, %6 : vector<8x128xf32>
    %c0_6 = arith.constant 0 : index
    %c0_7 = arith.constant 0 : index
    %8 = vector.load %arg7[%c0_6, %c0_7] : memref<8x128xf32, #tpu.memory_space<vmem>>, vector<8x128xf32>
    tpu.vector_store %arg7[%c0_6, %c0_7], %7 {strides = array<i32>} : memref<8x128xf32, #tpu.memory_space<vmem>>, vector<8x128xf32>,
    %c0_i32_8 = arith.constant 0 : i32
    %9 = arith.cmpi eq, %arg2, %c0_i32_8 : i32
    %10 = arith.extui %9 : i1 to i32
    %c0_i32_9 = arith.constant 0 : i32
    %11 = arith.cmpi ne, %10, %c0_i32_9 : i32
    scf.if %11 {
      %c0_10 = arith.constant 0 : index
      %c0_11 = arith.constant 0 : index
      %12 = vector.load %arg7[%c0_10, %c0_11] : memref<8x128xf32, #tpu.memory_space<vmem>>, vector<8x128xf32>
      %cst_12 = arith.constant 0.333333343 : f32
      %13 = vector.broadcast %cst_12 : f32 to vector<8x128xf32>
      %14 = arith.mulf %12, %13 : vector<8x128xf32>
      %c0_13 = arith.constant 0 : index
      %c0_14 = arith.constant 0 : index
      %15 = vector.load %arg5[%c0_13, %c0_14] : memref<1x128xf32, #tpu.memory_space<vmem>>, vector<1x128xf32>
      %16 = vector.broadcast %15 : vector<1x128xf32> to vector<8x128xf32>
      %17 = arith.addf %14, %16 : vector<8x128xf32>
      %c0_15 = arith.constant 0 : index
      %c0_16 = arith.constant 0 : index
      %18 = vector.load %arg6[%c0_15, %c0_16] : memref<8x128xf32, #tpu.memory_space<vmem>>, vector<8x128xf32>
      tpu.vector_store %arg6[%c0_15, %c0_16], %17 {strides = array<i32>} : memref<8x128xf32, #tpu.memory_space<vmem>>, vector<8x128xf32>,
    } else {
    }
    return
  }
  func.func @transform_0(%arg0: i32, %arg1: i32, %arg2: i32) -> (i32, i32) {
    %c0_i32 = arith.constant 0 : i32
    return %arg0, %arg2 : i32, i32
  }
  func.func @transform_1(%arg0: i32, %arg1: i32, %arg2: i32) -> (i32, i32) {
    %c0_i32 = arith.constant 0 : i32
    return %arg2, %arg1 : i32, i32
  }
  func.func @transform_2(%arg0: i32, %arg1: i32, %arg2: i32) -> (i32, i32) {
    %c0_i32 = arith.constant 0 : i32
    %c0_i32_0 = arith.constant 0 : i32
    return %c0_i32, %arg1 : i32, i32
  }
  func.func @transform_3(%arg0: i32, %arg1: i32, %arg2: i32) -> (i32, i32) {
    %c0_i32 = arith.constant 0 : i32
    return %arg0, %arg1 : i32, i32
  }
}

</mosaic_0001>

<bundles_post_ra>
// kernel: tpu_custom_call.1
= control target key start
LH: loop header
LB: loop body
LE: loop exit
PB: predicated region body
PF: predicated region fallthrough
CT: control target
= control target key end

     0   :  { %8 = vsyncpa [#allocation4], 0  ;;  %s321_s0 = inlined_call_operand.hbm [shape: bf16[8,128], index: 0, kind: input, shape index: {}]   ;;  %s322_s1 = inlined_call_operand.hbm [shape: bf16[128,128], index: 1, kind: input, shape index: {}]   ;;  %s323_s2 = inlined_call_operand.vmem [shape: f32[1,128], index: 2, kind: input, shape index: {}]   ;;  %s324_s3 = inlined_call_operand.hbm [shape: f32[8,128], index: 3, kind: output, shape index: {}]  }
   0x1   :  { %9 = vsyncpa [#allocation7], 0 }
   0x2   :  { %10 = vsyncpa [#allocation5], 0  ;;  %s16_s14 = sshll.u32 %s321_s0, 4  ;;  %s284_s15 = smov [#allocation3]   ;;  %s17_s14 = int_to_ptr.hbm [resolvable:$true] %s16_s14 }
   0x3   :  { %s18_s16 = sshll.u32 %s284_s15, 4  ;;  %s26_s19 = sshll.u32 %s322_s1, 4  ;;  %s19_s16 = int_to_ptr.vmem [resolvable:$true] %s18_s16  ;;  %s27_s19 = int_to_ptr.hbm [resolvable:$true] %s26_s19 }
   0x4   :  { %21 = dma.hbm_to_vmem [thread:$0]  %s17_s14, 64, %s19_s16, [#allocation4]  }
   0x5   :  { %s285_s20 = smov [#allocation6]   ;;  %s286_s22 = smov 64  }
   0x6   :  { %s28_s21 = sshll.u32 %s285_s20, 4  ;;  %s287_s23 = smov 4   ;;  %s29_s21 = int_to_ptr.vmem [resolvable:$true] %s28_s21 }
   0x7   :  { %34 = dma.hbm_to_vmem [thread:$0]  %s27_s19, 1024, %s29_s21, [#allocation7], %s286_s22, %s286_s22, %s287_s23  }
   0x8   :  { %278 = dma.done.wait [#allocation4], 64  }
   0x9   :  { %279 = vsyncadd [#allocation4], 4294967232 }
   0xa   :  { %280 = dma.done.wait [#allocation7], 1024  }
   0xb   :  { %281 = vsyncadd [#allocation7], 4294966272  ;;  %v199_v0 = vld [vmem:[#allocation6 + $0x38] sm:$0xff]  ;;  %v198_v1 = vld [vmem:[#allocation6 + $0x30] sm:$0xff]  ;;  %s288_s24 = smov [#allocation8]   ;;  %s149_s28 = sshll.u32 %s324_s3, 4  ;;  %s150_s28 = int_to_ptr.hbm [resolvable:$true] %s149_s28 }
   0xc   :  { %116 = vmatpush.bf16.msra.mxu0 %v199_v0  ;;  %v197_v2 = vld [vmem:[#allocation6 + $0x28] sm:$0xff]  ;;  %v196_v3 = vld [vmem:[#allocation6 + $0x20] sm:$0xff]  ;;  %v195_v4 = vld [vmem:[#allocation6 + $0x18] sm:$0xff]  ;;  %s147_s25 = sshll.u32 %s288_s24, 4  ;;  %s148_s25 = int_to_ptr.vmem [resolvable:$true] %s147_s25 }
   0xd   :  { %v194_v5 = vld [vmem:[#allocation6 + $0x10] sm:$0xff]  ;;  %v193_v6 = vld [vmem:[#allocation6 + $0x8] sm:$0xff]  ;;  %v192_v7 = vld [vmem:[#allocation6] sm:$0xff] }
   0xe   :  { %v51_v8 = vld [vmem:[#allocation3] sm:$0xf] }
   0xf   :  { %v205_v9 = vld [vmem:[%s323_s2] ss:$0 sm:$0xff] }
  0x10   :  { %117 = vmatpush.bf16.msra.mxu0 %v198_v1 }
  0x14   :  { %118 = vmatpush.bf16.msra.mxu0 %v197_v2 }
  0x18   :  { %119 = vmatpush.bf16.msra.mxu0 %v196_v3 }
  0x1c   :  { %120 = vmatpush.bf16.msra.mxu0 %v195_v4 }
  0x20   :  { %121 = vmatpush.bf16.msra.mxu0 %v194_v5 }
  0x24   :  { %122 = vmatpush.bf16.msra.mxu0 %v193_v6 }
  0x28   :  { %123 = vmatpush.bf16.msra.mxu0 %v192_v7 }
  0x2b   :  { %124 = vmatmul.bf16.vlgmr.msra.gmra.mxu0 %v51_v8 }
  0xa8   :  { %v125_v10 = vpop.f32.mrf.mxu0 }
  0xa9   :  { %v135_v11 = vmul.f32 0.33333334, %v125_v10 }
  0xab   :  { %v140_v12 = vadd.f32 %v205_v9, %v135_v11 }
  0xad   :  { %141 = vst [vmem:[#allocation8] sm:$0xff] %v140_v12 }
  0xae   :  { %152 = dma.vmem_to_hbm [thread:$0]  %s148_s25, 128, %s150_s28, [#allocation5]  }
  0xb0   :  { %v127_v13 = vpop.f32.mrf.mxu0 }
  0xb1   :  { %282 = dma.done.wait [#allocation5], 128  }
  0xb2   :  { %283 = vsyncadd [#allocation5], 4294967168 }
  0xb3   :  { %157 = vsyncpa [#allocation4], 1 }
  0xb4   :  { %158 = vsyncpa [#allocation7], 1 }
  0xb5   :  { %159 = vsyncpa [#allocation5], 1 }

</bundles_post_ra>
